<compile_context>
chip_gen: v6e
topology: v6e:2x2x1
jax: 0.10.0
libtpu: 0.0.40
codegen_flags: <defaults>
</compile_context>

<pallas_src>
import functools
import math

import jax
import jax.numpy as jnp
from jax import lax
from jax.experimental import pallas as pl
from jax.experimental.pallas import tpu as pltpu


def _fourier_pe_kernel(x_ref, wt_ref, o_ref, *, half_dim: int, nfeats: int,
                       scale: float):
    # x_ref: (TN, nfeats) f32, wt_ref: (nfeats, half_dim) f32, o_ref: (TN, dim)
    x = x_ref[...].astype(jnp.float32)        # (TN, nfeats)
    wt = wt_ref[...].astype(jnp.float32)      # (nfeats, half_dim)

    if nfeats <= 8:
        # Tiny contraction: VPU broadcast multiply-adds, skip the MXU entirely.
        s = x[:, 0:1] * wt[0:1, :]            # (TN, half_dim)
        for f in range(1, nfeats):
            s = s + x[:, f:f + 1] * wt[f:f + 1, :]
    else:
        s = lax.dot_general(
            x, wt,
            dimension_numbers=(((1,), (0,)), ((), ())),
            preferred_element_type=jnp.float32,
        )

    sin_v = jnp.sin(s)
    cos_v = jnp.cos(s)
    if scale != 1.0:
        sin_v = sin_v * scale
        cos_v = cos_v * scale

    # Write each half directly into its output slice (no concat / relayout).
    o_ref[:, :half_dim] = sin_v.astype(o_ref.dtype)
    o_ref[:, half_dim:] = cos_v.astype(o_ref.dtype)


def fourier_positional_encoding(x: jax.Array, w: jax.Array,
                                normalize: bool = False,
                                *, tile_n: int = 4096,
                                out_dtype=jnp.float32) -> jax.Array:
    """x: (N,) or (N, nfeats); w: (dim//2, nfeats). Returns (N, dim)."""
    if x.ndim == 1:
        x = x[:, None]
    x = x.astype(jnp.float32)
    w = w.astype(jnp.float32)

    n, nfeats = x.shape
    half_dim, wfeats = w.shape
    assert nfeats == wfeats, "feature dim of x must match w's second dim"
    assert tile_n % 8 == 0, "tile_n must be a multiple of 8"
    dim = 2 * half_dim

    # Row tile: either the full array (small N) or a multiple-of-8 tile.
    tn = n if n <= tile_n else tile_n
    grid = (pl.cdiv(n, tn),)

    # ||[sin(s), cos(s)]||_2 == sqrt(half_dim) exactly -> constant scale.
    scale = (1.0 / math.sqrt(half_dim)) if normalize else 1.0

    wt = w.T  # (nfeats, half_dim): rows broadcast cleanly over the lane axis.

    kernel = functools.partial(_fourier_pe_kernel,
                               half_dim=half_dim, nfeats=nfeats, scale=scale)

    return pl.pallas_call(
        kernel,
        out_shape=jax.ShapeDtypeStruct((n, dim), out_dtype),
        grid=grid,
        in_specs=[
            pl.BlockSpec((tn, nfeats), lambda i: (i, 0)),
            pl.BlockSpec((nfeats, half_dim), lambda i: (0, 0)),
        ],
        out_specs=pl.BlockSpec((tn, dim), lambda i: (i, 0)),
        compiler_params=pltpu.CompilerParams(
            dimension_semantics=("parallel",)),
    )(x, wt)


def _reference(x, w, normalize=False):
    if x.ndim == 1:
        x = x[:, None]
    s = x.astype(jnp.float32) @ w.astype(jnp.float32).T     # (N, half)
    v = jnp.concatenate([jnp.sin(s), jnp.cos(s)], axis=-1)  # (N, dim)
    if normalize:
        v = v / jnp.linalg.norm(v, axis=-1, keepdims=True)
    return v


if __name__ == "__main__":
    # Module-style deterministic init (synthetic, not a checkpoint load).
    key = jax.random.PRNGKey(0)
    k_w, k_x, k_w3, k_x3 = jax.random.split(key, 4)

    # --- Case 1: sigmas=[1.0, 10.0] (nfeats=2), dim=32, N=8, no normalize ---
    sigmas = [1.0, 10.0]
    dim = 32
    nfeats = len(sigmas)
    w = jax.random.normal(k_w, (dim // 2, nfeats), dtype=jnp.float32)
    w = w * jnp.asarray(sigmas, dtype=jnp.float32)[None, :]
    n = 8
    x = jax.random.uniform(k_x, (n, nfeats), dtype=jnp.float32)

    out = jax.block_until_ready(fourier_positional_encoding(x, w))
    ref = _reference(x, w)
    assert out.shape == (n, dim), out.shape
    assert jnp.allclose(out, ref, atol=1e-5, rtol=1e-5), (
        float(jnp.max(jnp.abs(out - ref))))

    # --- Case 2: 1-D input path (x.ndim == 1), single sigma, normalize=True ---
    w1 = jax.random.normal(k_w, (dim // 2, 1), dtype=jnp.float32) * 5.0
    x1 = jax.random.uniform(k_x, (n,), dtype=jnp.float32)
    out1 = jax.block_until_ready(
        fourier_positional_encoding(x1, w1, normalize=True))
    ref1 = _reference(x1, w1, normalize=True)
    assert jnp.allclose(out1, ref1, atol=1e-5, rtol=1e-5), (
        float(jnp.max(jnp.abs(out1 - ref1))))

    # --- Case 3: tiled + ragged final block (N=200, tile_n=64), normalize ---
    sigmas3 = [1.0, 2.0, 4.0]
    dim3 = 64
    w3 = jax.random.normal(k_w3, (dim3 // 2, len(sigmas3)), dtype=jnp.float32)
    w3 = w3 * jnp.asarray(sigmas3, dtype=jnp.float32)[None, :]
    x3 = jax.random.uniform(k_x3, (200, len(sigmas3)), dtype=jnp.float32)
    out3 = jax.block_until_ready(
        fourier_positional_encoding(x3, w3, normalize=True, tile_n=64))
    ref3 = _reference(x3, w3, normalize=True)
    assert out3.shape == (200, dim3), out3.shape
    assert jnp.allclose(out3, ref3, atol=1e-5, rtol=1e-5), (
        float(jnp.max(jnp.abs(out3 - ref3))))

    print("KERNEL_OK")
</pallas_src>

<mosaic_0001>
module attributes {stable_mosaic.version = 11 : i64} {
  func.func @_fourier_pe_kernel(%arg0: i32, %arg1: memref<8x2xf32, #tpu.memory_space<vmem>>, %arg2: memref<2x16xf32, #tpu.memory_space<vmem>>, %arg3: memref<8x32xf32, #tpu.memory_space<vmem>>) attributes {dimension_semantics = [#tpu.dimension_semantics<parallel>], iteration_bounds = array<i64: 1>, scalar_prefetch = 0 : i64, scratch_operands = 0 : i64, tpu.core_type = #tpu.core_type<tc>, window_params = [{transform_indices = @transform_0, window_bounds = array<i64: 8, 2>}, {pipeline_mode = #tpu.pipeline_mode<synchronous>, transform_indices = @transform_1, window_bounds = array<i64: 2, 16>}, {transform_indices = @transform_2, window_bounds = array<i64: 8, 32>}]} {
    %c0 = arith.constant 0 : index
    %c0_0 = arith.constant 0 : index
    %0 = vector.load %arg1[%c0, %c0_0] : memref<8x2xf32, #tpu.memory_space<vmem>>, vector<8x2xf32>
    %c0_1 = arith.constant 0 : index
    %c0_2 = arith.constant 0 : index
    %1 = vector.load %arg2[%c0_1, %c0_2] : memref<2x16xf32, #tpu.memory_space<vmem>>, vector<2x16xf32>
    %2 = vector.extract_strided_slice %0 {offsets = [0, 0], sizes = [8, 1], strides = [1, 1]} : vector<8x2xf32> to vector<8x1xf32>
    %3 = vector.extract_strided_slice %1 {offsets = [0, 0], sizes = [1, 16], strides = [1, 1]} : vector<2x16xf32> to vector<1x16xf32>
    %4 = vector.broadcast %2 : vector<8x1xf32> to vector<8x16xf32>
    %5 = vector.broadcast %3 : vector<1x16xf32> to vector<8x16xf32>
    %6 = arith.mulf %4, %5 : vector<8x16xf32>
    %7 = vector.extract_strided_slice %0 {offsets = [0, 1], sizes = [8, 1], strides = [1, 1]} : vector<8x2xf32> to vector<8x1xf32>
    %8 = vector.extract_strided_slice %1 {offsets = [1, 0], sizes = [1, 16], strides = [1, 1]} : vector<2x16xf32> to vector<1x16xf32>
    %9 = vector.broadcast %7 : vector<8x1xf32> to vector<8x16xf32>
    %10 = vector.broadcast %8 : vector<1x16xf32> to vector<8x16xf32>
    %11 = arith.mulf %9, %10 : vector<8x16xf32>
    %12 = arith.addf %6, %11 : vector<8x16xf32>
    %13 = math.sin %12 : vector<8x16xf32>
    %14 = math.cos %12 : vector<8x16xf32>
    %c0_3 = arith.constant 0 : index
    %c0_4 = arith.constant 0 : index
    %15 = vector.load %arg3[%c0_3, %c0_4] : memref<8x32xf32, #tpu.memory_space<vmem>>, vector<8x16xf32>
    tpu.vector_store %arg3[%c0_3, %c0_4], %13 {strides = array<i32>} : memref<8x32xf32, #tpu.memory_space<vmem>>, vector<8x16xf32>,
    %c0_5 = arith.constant 0 : index
    %c16 = arith.constant 16 : index
    %16 = vector.load %arg3[%c0_5, %c16] : memref<8x32xf32, #tpu.memory_space<vmem>>, vector<8x16xf32>
    tpu.vector_store %arg3[%c0_5, %c16], %14 {strides = array<i32>} : memref<8x32xf32, #tpu.memory_space<vmem>>, vector<8x16xf32>,
    return
  }
  func.func @transform_0(%arg0: i32) -> (i32, i32) {
    %c0_i32 = arith.constant 0 : i32
    %c0_i32_0 = arith.constant 0 : i32
    return %arg0, %c0_i32 : i32, i32
  }
  func.func @transform_1(%arg0: i32) -> (i32, i32) {
    %c0_i32 = arith.constant 0 : i32
    %c0_i32_0 = arith.constant 0 : i32
    %c0_i32_1 = arith.constant 0 : i32
    return %c0_i32, %c0_i32_0 : i32, i32
  }
  func.func @transform_2(%arg0: i32) -> (i32, i32) {
    %c0_i32 = arith.constant 0 : i32
    %c0_i32_0 = arith.constant 0 : i32
    return %arg0, %c0_i32 : i32, i32
  }
}

</mosaic_0001>

<bundles_post_ra>
// kernel: tpu_custom_call.1
= control target key start
LH: loop header
LB: loop body
LE: loop exit
PB: predicated region body
PF: predicated region fallthrough
CT: control target
= control target key end

     0   :  { %v313_v1 = vmov 0   ;;  %s369_s0 = inlined_call_operand.vmem [shape: f32[8,2], index: 0, kind: input, shape index: {}]   ;;  %s370_s1 = inlined_call_operand.vmem [shape: f32[2,16], index: 1, kind: input, shape index: {}]   ;;  %s371_s2 = inlined_call_operand.hbm [shape: f32[8,32], index: 2, kind: output, shape index: {}]  }
   0x1   :  { %v12_v0 = vld [vmem:[%s369_s0] sm:$0xff]  ;;  %285 = vset.pattern.permute.xlu0 %v313_v1 }
   0x2   :  { %7 = vsyncpa [#allocation3], 0  ;;  %16 = vperm.xlu0 %285, %v12_v0   ;;  %v314_v2 = vmov 1   ;;  %v19_v3 = vlaneseq  ;;  %v13_v7 = vld [vmem:[%s370_s1] sm:$0x3]  ;;  %vm241_vm11 = vcmask 130048  }
   0x3   :  { %v315_v25 = vmov 683565275   ;;  %v316_v27 = vmov 2475754826   ;;  %v317_v30 = vmov 2131351028  }
   0x4   :  { %v20_v4 = vshrl.u32 %v19_v3, 7  ;;  %v318_v33 = vmov 2102212464   ;;  %v319_v36 = vmov 920167782   ;;  %s321_s0 = smov 16  }
   0x5   :  { %v320_v39 = vmov 1326507024   ;;  %s322_s1 = smov [#allocation2]  }
   0x6   :  { %286 = vset.pattern.permute.xlu0 %v314_v2  ;;  %v21_v5 = vsub.s32 0, %v20_v4  ;;  %v30_v6 = vsub.s32 1, %v20_v4  ;;  %s255_s13 = sshll.u32 %s322_s1, 4  ;;  %s256_s13 = int_to_ptr.vmem [resolvable:$true] %s255_s13 }
   0x7   :  { %25 = vperm.xlu0 %286, %v12_v0   ;;  %s291_s14 = scalar_lea.vmem %s256_s13, 128  ;;  %p296_p1 = scmp.lt.s32.totalorder %s256_s13, %s256_s13 }
   0x8   :  { %v22_v9 = vrot.slane %v13_v7, %v21_v5  ;;  %v31_v10 = vrot.slane %v13_v7, %v30_v6  ;;  %p292_p0 = scmp.ne.s32.totalorder %s256_s13, %s291_s14  ;;  %p297_p2 = scmp.lt.s32.totalorder %s291_s14, %s291_s14 }
   0xa   :  { %p298_p3 = por %p297_p2, %p296_p1 }
   0xc   :  { %p299_p4 = pnand %p298_p3, %p292_p0 }
  0x7d   :  { %v17_v8 = vpop.permute.xlu0 %16 }
  0x7e   :  { %v23_v12 = vmul.f32 %v22_v9, %v17_v8 }
  0x82   :  { %v26_v11 = vpop.permute.xlu0 %25 }
  0x83   :  { %v32_v13 = vmul.f32 %v31_v10, %v26_v11 }
  0x85   :  { %v344_v14 = vadd.f32 %v32_v13, %v23_v12 }
  0x87   :  { %v37_v15 = vand.u32 2139095040, %v344_v14  ;;  %v34_v19 = vand.u32 2147483647, %v344_v14  ;;  %vm36_vm7 = vcmp.lt.s32.totalorder %v344_v14, 0 }
  0x89   :  { %v38_v16 = vshrl.u32 %v37_v15, 23  ;;  %v41_v23 = vand.u32 8388607, %v34_v19  ;;  %vm35_vm8 = vcmp.le.f32.partialorder %v34_v19, 0.7853982 }
  0x8b   :  { %v263_v17 = vadd.s32 4294967169, %v38_v16  ;;  %v42_v41 = vor.u32 8388608, %v41_v23 }
  0x8d   :  { %v44_v18 = vadd.s32 1, %v263_v17  ;;  %v82_v55 = vshll.u32 %v42_v41, 8 }
  0x8f   :  { %vm45_vm0 = vcmp.gt.s32.totalorder %v44_v18, 0 }
  0x90   :  { %v46_v20 = vsel %vm45_vm0, %v44_v18, 0  ;;  %vm126_vm0 = vweird.f32 %v344_v14 }
  0x91   :  { %v48_v21 = vand.u32 31, %v46_v20  ;;  %v47_v24 = vshrl.u32 %v46_v20, 5 }
  0x93   :  { %v49_v22 = vsub.s32 32, %v48_v21  ;;  %v51_v26 = vshll.u32 %v315_v25, %v48_v21  ;;  %v54_v28 = vshll.u32 %v316_v27, %v48_v21  ;;  %v57_v32 = vshll.u32 %v317_v30, %v48_v21 }
  0x94   :  { %v60_v35 = vshll.u32 %v318_v33, %v48_v21  ;;  %v63_v38 = vshll.u32 %v319_v36, %v48_v21  ;;  %vm66_vm1 = vcmp.lt.s32.totalorder %v47_v24, 1  ;;  %vm69_vm2 = vcmp.lt.s32.totalorder %v47_v24, 4 }
  0x95   :  { %v52_v29 = vshrl.u32 %v316_v27, %v49_v22  ;;  %v55_v31 = vshrl.u32 %v317_v30, %v49_v22  ;;  %v58_v34 = vshrl.u32 %v318_v33, %v49_v22  ;;  %v61_v37 = vshrl.u32 %v319_v36, %v49_v22 }
  0x96   :  { %v64_v40 = vshrl.u32 %v320_v39, %v49_v22  ;;  %v50_v50 = vshrl.u32 %v315_v25, %v49_v22  ;;  %vm68_vm3 = vcmp.lt.s32.totalorder %v47_v24, 3  ;;  %vm67_vm4 = vcmp.lt.s32.totalorder %v47_v24, 2 }
  0x97   :  { %v53_v42 = vor.u32 %v52_v29, %v51_v26  ;;  %v56_v43 = vor.u32 %v55_v31, %v54_v28  ;;  %v59_v44 = vor.u32 %v58_v34, %v57_v32  ;;  %v62_v45 = vor.u32 %v61_v37, %v60_v35 }
  0x98   :  { %v65_v46 = vor.u32 %v64_v40, %v63_v38 }
  0x99   :  { %v71_v47 = vsel %vm69_vm2, %v59_v44, 2102212464  ;;  %v74_v48 = vsel %vm66_vm1, %v53_v42, %v56_v43  ;;  %v78_v49 = vsel %vm66_vm1, %v56_v43, %v59_v44  ;;  %v75_v51 = vsel %vm69_vm2, %v62_v45, 920167782 }
  0x9a   :  { %v79_v52 = vsel %vm69_vm2, %v65_v46, 1326507024  ;;  %v76_v53 = vsel %vm68_vm3, %v59_v44, %v75_v51  ;;  %v70_v56 = vsel %vm66_vm1, %v50_v50, %v53_v42  ;;  %v72_v57 = vsel %vm68_vm3, %v56_v43, %v71_v47 }
  0x9b   :  { %v80_v54 = vsel %vm68_vm3, %v62_v45, %v79_v52  ;;  %v77_v58 = vsel %vm67_vm4, %v74_v48, %v76_v53  ;;  %v73_v0 = vsel %vm67_vm4, %v70_v56, %v72_v57  ;;  %vm247_vm1 = vcmask 261248  }
  0x9c   :  { %v81_v59 = vsel %vm67_vm4, %v78_v49, %v80_v54  ;;  %v353_v62 = vmul.u32.u64.low %v82_v55, %v77_v58  ;;  %v354_v63 = vmul.u32.u64.high %v82_v55, %v77_v58, %v353_v62  ;;  %v89_v2 = vmul.u32 %v82_v55, %v73_v0 }
  0x9d   :  { %v350_v60 = vmul.u32.u64.low %v82_v55, %v81_v59  ;;  %v351_v61 = vmul.u32.u64.high %v82_v55, %v81_v59, %v350_v60 }
  0x9e   :  { %v92_v1 = vadd.s32 1, %v354_v63 }
  0x9f   :  { %vm91_vm5 = vc.u32 %v351_v61, %v353_v62  ;;  %v90_v15 = vadd.s32 %v353_v62, %v351_v61 }
  0xa0   :  { %v93_v3 = vsel %vm91_vm5, %v92_v1, %v354_v63 }
  0xa1   :  { %v94_v4 = vadd.s32 %v93_v3, %v89_v2 }
  0xa3   :  { %v95_v5 = vadd.s32 536870912, %v94_v4 }
  0xa5   :  { %v96_v6 = vshrl.u32 %v95_v5, 30 }
  0xa7   :  { %v97_v7 = vshll.u32 %v96_v6, 30  ;;  %v120_v29 = vsub.s32 4, %v96_v6 }
  0xa9   :  { %v98_v8 = vsub.s32 %v94_v4, %v97_v7  ;;  %v121_v32 = vsel %vm36_vm7, %v120_v29, %v96_v6 }
  0xaa   :  { %v123_v33 = vsel %vm35_vm8, 0, %v121_v32 }
  0xab   :  { %v100_v9 = vsub.s32 0, %v98_v8  ;;  %v127_v34 = vadd.s32 3, %v123_v33  ;;  %v231_v36 = vand.u32 3, %v123_v33 }
  0xad   :  { %v264_v10 = vmin.u32 %v100_v9, %v98_v8  ;;  %v128_v35 = vand.u32 3, %v127_v34  ;;  %vm236_vm10 = vcmp.eq.s32.totalorder %v231_v36, 2  ;;  %vm233_vm13 = vcmp.eq.s32.totalorder %v231_v36, 0 }
  0xae   :  { %vm232_vm15 = vcmp.lt.s32.totalorder %v231_v36, 2 }
  0xaf   :  { %v102_v11 = vclz %v264_v10  ;;  %vm133_vm9 = vcmp.eq.s32.totalorder %v128_v35, 2  ;;  %vm130_vm12 = vcmp.eq.s32.totalorder %v128_v35, 0  ;;  %vm129_vm14 = vcmp.lt.s32.totalorder %v128_v35, 2 }
  0xb1   :  { %v265_v12 = vadd.s32 4294967294, %v102_v11 }
  0xb3   :  { %vm266_vm6 = vcmp.lt.s32.totalorder %v265_v12, 0 }
  0xb4   :  { %v105_v13 = vsel %vm266_vm6, 0, %v265_v12 }
  0xb5   :  { %v106_v16 = vsub.s32 32, %v105_v13  ;;  %v110_v17 = vsub.s32 4294967266, %v105_v13  ;;  %v107_v18 = vshll.u32 %v98_v8, %v105_v13 }
  0xb7   :  { %v108_v20 = vshrl.u32 %v90_v15, %v106_v16  ;;  %v111_v21 = vadd.s32 127, %v110_v17 }
  0xb9   :  { %v109_v22 = vor.u32 %v108_v20, %v107_v18  ;;  %v112_v23 = vshll.u32 %v111_v21, 23 }
  0xbb   :  { %v113_v24 = vor.u32 4788187, %v112_v23  ;;  %v116_v26 = vcvt.s32.f32 %v109_v22 }
  0xbd   :  { %v114_v25 = vand.u32 2147483647, %v113_v24 }
  0xbf   :  { %v117_v27 = vmul.f32 %v116_v26, %v114_v25 }
  0xc1   :  { %v118_v28 = vxor.u32 2147483648, %v117_v27 }
  0xc3   :  { %v119_v30 = vsel %vm36_vm7, %v118_v28, %v117_v27 }
  0xc4   :  { %v122_v31 = vsel %vm35_vm8, %v344_v14, %v119_v30 }
  0xc5   :  { %287 = vcosq.f32 %v122_v31 }
  0xc6   :  { %289 = vsinq.f32 %v122_v31 }
  0xd2   :  { %v288_v37 = vpop.eup %287 }
  0xd3   :  { %v290_v38 = vpop.eup %289  ;;  %v134_v39 = vxor.u32 2147483648, %v288_v37 }
  0xd4   :  { %v131_v40 = vxor.u32 2147483648, %v290_v38 }
  0xd5   :  { %v238_v19 = vsel %vm236_vm10, %v134_v39, %v290_v38  ;;  %v135_v41 = vsel %vm133_vm9, %v134_v39, %v290_v38 }
  0xd6   :  { %v235_v42 = vsel %vm233_vm13, %v288_v37, %v131_v40  ;;  %v132_v43 = vsel %vm130_vm12, %v288_v37, %v131_v40 }
  0xd7   :  { %v239_v44 = vsel %vm232_vm15, %v235_v42, %v238_v19  ;;  %v136_v45 = vsel %vm129_vm14, %v132_v43, %v135_v41 }
  0xd8   :  { %v240_v46 = vsel %vm126_vm0, nan, %v239_v44  ;;  %v137_v47 = vsel %vm126_vm0, nan, %v136_v45 }
  0xd9   :  { %244 = vrot.lane.b32.xlu1 %v240_v46, %s321_s0  ;;  %242 = vst.msk [vmem:[#allocation2] sm:$0xff] %vm241_vm11, %v137_v47 }
 0x14b   :  { %v245_v48 = vpop.permute.xlu1 %244 }
 0x14c   :  { %248 = vst.msk [vmem:[#allocation2] sm:$0xff] %vm247_vm1, %v245_v48 }
 0x14d   :  { %302 = shalt.err (!%p299_p4)
}
 0x14e   :  { %258 = dma.vmem_to_hbm [thread:$0]  %s256_s13, 128, %s371_s2, [#allocation3]  }
 0x14f   :  { %311 = dma.done.wait [#allocation3], 128  }
 0x150   :  { %312 = vsyncadd [#allocation3], 4294967168 }
 0x151   :  { %262 = vsyncpa [#allocation3], 1 }

</bundles_post_ra>
